<compile_context>
chip_gen: v7x
topology: tpu7x:2x2x1
jax: 0.10.0
libtpu: 0.0.40
codegen_flags: <defaults>
</compile_context>

<pallas_src>
import functools

import jax
import jax.numpy as jnp
from jax.experimental import pallas as pl
from jax.experimental.pallas import tpu as pltpu


# ----------------------------------------------------------------------------
# Pallas kernels
# ----------------------------------------------------------------------------
def _deconv_gn_gelu_kernel(p_ref, w_ref, bias_ref, mask_ref, g_ref, b_ref,
                           ohcg_ref, ohgc_ref, o_ref, *, eps, inv_count):
    """One image per grid step.

    p:(1,R,K) patches, w:(K,C4), bias/mask:(R,C4), g/b:(1,C4),
    oh_cg:(C4,G), oh_gc:(G,C4).  Output (1,R,C4), phase-layout, masked to zero
    on invalid (cropped) border positions so it can be windowed directly by the
    next layer.
    """
    y = jnp.dot(p_ref[0], w_ref[...],
                preferred_element_type=jnp.float32) + bias_ref[...]     # (R, C4)
    m = mask_ref[...]
    oh_cg = ohcg_ref[...]
    oh_gc = ohgc_ref[...]

    # GroupNorm statistics over the *valid* output pixels only (mask), two-pass.
    s = jnp.sum(y * m, axis=0, keepdims=True)                           # (1, C4)
    mean_c = jnp.dot(jnp.dot(s, oh_cg, preferred_element_type=jnp.float32) * inv_count,
                     oh_gc, preferred_element_type=jnp.float32)         # (1, C4)
    d = (y - mean_c) * m
    ssq = jnp.sum(d * d, axis=0, keepdims=True)                         # (1, C4)
    var_c = jnp.dot(jnp.dot(ssq, oh_cg, preferred_element_type=jnp.float32) * inv_count,
                    oh_gc, preferred_element_type=jnp.float32)          # (1, C4)
    inv = jax.lax.rsqrt(var_c + eps)

    yn = (y - mean_c) * inv * g_ref[...] + b_ref[...]
    # exact (erf) GELU, matching PyTorch nn.GELU default
    act = 0.5 * yn * (1.0 + jax.lax.erf(yn * jnp.float32(0.7071067811865476)))
    o_ref[0] = (act * m).astype(o_ref.dtype)


def _deconv_sigmoid_kernel(p_ref, w_ref, bias_ref, o_ref):
    """Final layer: GEMM + bias + sigmoid. p:(1,R,K) w:(K,Nc) bias:(R,Nc)."""
    y = jnp.dot(p_ref[0], w_ref[...],
                preferred_element_type=jnp.float32) + bias_ref[...]
    o_ref[0] = jax.nn.sigmoid(y).astype(o_ref.dtype)


def _deconv_gn_gelu_call(patches, wmat, biasmap, mask, gamma4, beta4,
                         oh_cg, oh_gc, eps, inv_count):
    N, R, K = patches.shape
    C4 = wmat.shape[1]
    G = oh_cg.shape[1]
    kern = functools.partial(_deconv_gn_gelu_kernel, eps=eps, inv_count=inv_count)
    return pl.pallas_call(
        kern,
        out_shape=jax.ShapeDtypeStruct((N, R, C4), jnp.float32),
        grid=(N,),
        in_specs=[
            pl.BlockSpec((1, R, K), lambda i: (i, 0, 0)),
            pl.BlockSpec((K, C4), lambda i: (0, 0)),
            pl.BlockSpec((R, C4), lambda i: (0, 0)),
            pl.BlockSpec((R, C4), lambda i: (0, 0)),
            pl.BlockSpec((1, C4), lambda i: (0, 0)),
            pl.BlockSpec((1, C4), lambda i: (0, 0)),
            pl.BlockSpec((C4, G), lambda i: (0, 0)),
            pl.BlockSpec((G, C4), lambda i: (0, 0)),
        ],
        out_specs=pl.BlockSpec((1, R, C4), lambda i: (i, 0, 0)),
        compiler_params=pltpu.CompilerParams(dimension_semantics=("parallel",)),
    )(patches, wmat, biasmap, mask, gamma4, beta4, oh_cg, oh_gc)


def _deconv_sigmoid_call(patches, wmat, biasmap):
    N, R, K = patches.shape
    Nc = wmat.shape[1]
    return pl.pallas_call(
        _deconv_sigmoid_kernel,
        out_shape=jax.ShapeDtypeStruct((N, R, Nc), jnp.float32),
        grid=(N,),
        in_specs=[
            pl.BlockSpec((1, R, K), lambda i: (i, 0, 0)),
            pl.BlockSpec((K, Nc), lambda i: (0, 0)),
            pl.BlockSpec((R, Nc), lambda i: (0, 0)),
        ],
        out_specs=pl.BlockSpec((1, R, Nc), lambda i: (i, 0, 0)),
        compiler_params=pltpu.CompilerParams(dimension_semantics=("parallel",)),
    )(patches, wmat, biasmap)


# ----------------------------------------------------------------------------
# Wrapper-side glue: weight re-packing, 2x2-window im2col, depth-to-space.
# ----------------------------------------------------------------------------
def _subpixel_weight_6d(w_pt):
    """PyTorch ConvTranspose weight (Cin,Cout,4,4) -> (2,2,Cin,4*Cout).

    Entry [a,b,ci,(v,u,co)] = w[ci, co, 2+v-2a, 2+u-2b].
    """
    cin, cout = w_pt.shape[0], w_pt.shape[1]
    kidx = jnp.array([[2, 3], [0, 1]], dtype=jnp.int32)   # [offset a/b, subpixel v/u]
    w6 = w_pt[:, :, kidx, :]            # (Cin, Cout, a, v, kw)
    w6 = w6[:, :, :, :, kidx]           # (Cin, Cout, a, v, b, u)
    w6 = jnp.transpose(w6, (2, 4, 0, 3, 5, 1))            # (a, b, Cin, v, u, Cout)
    return w6.reshape(2, 2, cin, 4 * cout)


def _patches(xpad):
    """Already-padded (N, H+2, W+2, C) -> 2x2-window patches (N, (H+1)*(W+1), 4C)."""
    N, Hp, Wp, C = xpad.shape
    Hw, Ww = Hp - 1, Wp - 1
    slabs = [xpad[:, a:a + Hw, b:b + Ww, :] for a in range(2) for b in range(2)]
    return jnp.concatenate(slabs, axis=-1).reshape(N, Hw * Ww, 4 * C)


def _phase_to_padded(o, H, W, C):
    """(N, (H+1)*(W+1), 4C) phase layout -> (N, 2H+2, 2W+2, C) depth-to-space.

    When `o` is border-masked (kernel 1) the result is exactly the zero-padded
    input required by the next layer's 2x2 windowing.
    """
    N = o.shape[0]
    o6 = o.reshape(N, H + 1, W + 1, 2, 2, C)
    o6 = jnp.transpose(o6, (0, 1, 3, 2, 4, 5))            # N, t, v, s, u, C
    return o6.reshape(N, 2 * H + 2, 2 * W + 2, C)


def _phase_to_output(o, H, W, C):
    """Final layer: crop the (unmasked) extended map to the true (N,2H,2W,C)."""
    ext = _phase_to_padded(o[:, :, :4 * C], H, W, C)
    return ext[:, 1:2 * H + 1, 1:2 * W + 1, :]


def _valid_mask(H, W, C4):
    """(R, C4) 0/1 mask of phase-layout entries that map to real output pixels."""
    t = jnp.arange(H + 1)
    s = jnp.arange(W + 1)
    vu = jnp.arange(2)
    ry = 2 * t[:, None] - 1 + vu[None, :]
    cx = 2 * s[:, None] - 1 + vu[None, :]
    rv = (ry >= 0) & (ry < 2 * H)                         # (H+1, 2)
    cv = (cx >= 0) & (cx < 2 * W)                         # (W+1, 2)
    m = rv[:, None, :, None] & cv[None, :, None, :]       # (H+1, W+1, 2, 2)
    C = C4 // 4
    m = jnp.broadcast_to(m[..., None], (H + 1, W + 1, 2, 2, C)).astype(jnp.float32)
    return m.reshape((H + 1) * (W + 1), C4)


def _group_onehots(C, groups):
    """Hoisted GroupNorm reduction matrices for the (v,u,c) phase column layout."""
    cpg = C // groups
    j = jnp.arange(4 * C)
    g = (j % C) // cpg
    oh_cg = (g[:, None] == jnp.arange(groups)[None, :]).astype(jnp.float32)  # (4C, G)
    return oh_cg, oh_cg.T


def _first_biasmap(b_fc, w6_first, b_dc, H, W):
    """Per-row bias for the fc-folded first deconv GEMM (fc bias only contributes
    where the fc output is interior, i.e. not in the zero padding)."""
    cout4 = w6_first.shape[-1]
    inter_r = ((jnp.arange(H + 2) >= 1) & (jnp.arange(H + 2) <= H)).astype(jnp.float32)
    inter_c = ((jnp.arange(W + 2) >= 1) & (jnp.arange(W + 2) <= W)).astype(jnp.float32)
    bm = jnp.zeros((H + 1, W + 1, cout4), jnp.float32)
    for a in range(2):
        for b in range(2):
            vec = b_fc @ w6_first[a, b]                               # (4*Cout,)
            m2 = jnp.outer(inter_r[a:a + H + 1], inter_c[b:b + W + 1])
            bm = bm + m2[:, :, None] * vec[None, None, :]
    bm = bm + jnp.tile(b_dc, 4)[None, None, :]
    return bm.reshape((H + 1) * (W + 1), cout4)


# ----------------------------------------------------------------------------
# Decoder: parameter init + forward
# ----------------------------------------------------------------------------
def init_decoder_params(key, latent_dim, hidden_dims, output_dim):
    num_layers = len(hidden_dims)
    keys = iter(jax.random.split(key, 4 * num_layers + 4))
    params = {
        "fc_w": 0.1 * jax.random.normal(next(keys), (hidden_dims[-1], latent_dim, 1, 1), jnp.float32),
        "fc_b": 0.1 * jax.random.normal(next(keys), (hidden_dims[-1],), jnp.float32),
        "deconv": [],
        "gn": [],
    }
    for i in range(num_layers - 1, 0, -1):
        cin, cout = hidden_dims[i], hidden_dims[i - 1]
        params["deconv"].append((
            0.1 * jax.random.normal(next(keys), (cin, cout, 4, 4), jnp.float32),
            0.1 * jax.random.normal(next(keys), (cout,), jnp.float32),
        ))
        params["gn"].append((
            1.0 + 0.1 * jax.random.normal(next(keys), (cout,), jnp.float32),
            0.1 * jax.random.normal(next(keys), (cout,), jnp.float32),
        ))
    params["deconv"].append((
        0.1 * jax.random.normal(next(keys), (hidden_dims[0], output_dim, 4, 4), jnp.float32),
        0.1 * jax.random.normal(next(keys), (output_dim,), jnp.float32),
    ))
    return params


def decoder_forward(params, z_nchw, groups=16, eps=1e-5):
    x = jnp.transpose(z_nchw, (0, 2, 3, 1)).astype(jnp.float32)   # NCHW -> NHWC
    N, H, W, latent = x.shape
    deconvs = params["deconv"]
    gns = params["gn"]
    num_deconv = len(deconvs)

    h_top = params["fc_w"].shape[0]
    w_fc = params["fc_w"].reshape(h_top, latent).T                # (latent, h_top)
    b_fc = params["fc_b"]

    # Patches of the (zero-padded) latent map; fc is folded into the first GEMM.
    cur_patches = _patches(jnp.pad(x, ((0, 0), (1, 1), (1, 1), (0, 0))))
    cur_H, cur_W = H, W
    y = None

    for li, (w_pt, b_dc) in enumerate(deconvs):
        cin, cout = w_pt.shape[0], w_pt.shape[1]
        w6 = _subpixel_weight_6d(w_pt)                            # (2,2,cin,4*cout)
        R = (cur_H + 1) * (cur_W + 1)

        if li == 0:
            # Fold the 1x1 fc conv into the first deconv GEMM.
            wmat = jnp.einsum("le,abeD->ablD", w_fc, w6).reshape(4 * latent, 4 * cout)
            biasmap = _first_biasmap(b_fc, w6, b_dc, cur_H, cur_W)
        else:
            wmat = w6.reshape(4 * cin, 4 * cout)
            biasmap = jnp.broadcast_to(jnp.tile(b_dc, 4)[None, :], (R, 4 * cout))

        is_last = li == num_deconv - 1
        if not is_last:
            gamma, beta = gns[li]
            gamma4 = jnp.tile(gamma, 4)[None, :]
            beta4 = jnp.tile(beta, 4)[None, :]
            mask = _valid_mask(cur_H, cur_W, 4 * cout)
            oh_cg, oh_gc = _group_onehots(cout, groups)
            inv_count = 1.0 / (4.0 * cur_H * cur_W * (cout // groups))
            o = _deconv_gn_gelu_call(cur_patches, wmat, biasmap, mask,
                                     gamma4, beta4, oh_cg, oh_gc, eps, inv_count)
            # Masked phase output -> zero-padded input of the next layer -> patches.
            y_ext = _phase_to_padded(o, cur_H, cur_W, cout)
            cur_patches = _patches(y_ext)
            cur_H, cur_W = 2 * cur_H, 2 * cur_W
        else:
            # Lane-dense output: pad GEMM width to a multiple of 128.
            n_cols = ((4 * cout + 127) // 128) * 128
            w_pad = jnp.pad(wmat, ((0, 0), (0, n_cols - 4 * cout)))
            b_pad = jnp.pad(biasmap, ((0, 0), (0, n_cols - 4 * cout)))
            o = _deconv_sigmoid_call(cur_patches, w_pad, b_pad)
            y = _phase_to_output(o, cur_H, cur_W, cout)
            cur_H, cur_W = 2 * cur_H, 2 * cur_W

    return jnp.transpose(y, (0, 3, 1, 2))                         # NHWC -> NCHW


# ----------------------------------------------------------------------------
# Pure-JAX reference (XLA) for validation
# ----------------------------------------------------------------------------
def reference_forward(params, z_nchw):
    x = jnp.transpose(z_nchw, (0, 2, 3, 1))
    Cout = params["fc_w"].shape[0]
    x = jnp.einsum("nhwc,oc->nhwo", x, params["fc_w"].reshape(Cout, -1)) + params["fc_b"]

    def convT(x, w, b):
        rhs = jnp.transpose(w[:, :, ::-1, ::-1], (2, 3, 0, 1))    # HWIO
        y = jax.lax.conv_general_dilated(
            x, rhs, window_strides=(1, 1), padding=((2, 2), (2, 2)),
            lhs_dilation=(2, 2), dimension_numbers=("NHWC", "HWIO", "NHWC"))
        return y + b

    def gn_gelu(x, gamma, beta, groups=16, eps=1e-5):
        N, H, W_, C = x.shape
        xr = x.reshape(N, H * W_, groups, C // groups)
        mean = xr.mean(axis=(1, 3), keepdims=True)
        var = ((xr - mean) ** 2).mean(axis=(1, 3), keepdims=True)
        xn = ((xr - mean) / jnp.sqrt(var + eps)).reshape(N, H, W_, C)
        y = xn * gamma + beta
        return 0.5 * y * (1.0 + jax.lax.erf(y / jnp.sqrt(2.0)))

    for idx, (w, b) in enumerate(params["deconv"][:-1]):
        x = convT(x, w, b)
        gamma, beta = params["gn"][idx]
        x = gn_gelu(x, gamma, beta)
    w, b = params["deconv"][-1]
    x = jax.nn.sigmoid(convT(x, w, b))
    return jnp.transpose(x, (0, 3, 1, 2))


if __name__ == "__main__":
    latent_dim = 8
    hidden_dims = [32, 64]        # GroupNorm(16, .) needs channels % 16 == 0
    output_dim = 3
    input_size = 16               # divisible by 2**len(hidden_dims) = 4
    num_layers = len(hidden_dims)

    key = jax.random.PRNGKey(0)
    kp, kz = jax.random.split(key)
    params = init_decoder_params(kp, latent_dim, hidden_dims, output_dim)

    z_spatial = input_size // (2 ** num_layers)            # 4
    z = jax.random.normal(kz, (2, latent_dim, z_spatial, z_spatial), jnp.float32)

    fwd = jax.jit(decoder_forward)
    out = jax.block_until_ready(fwd(params, z))
    ref = jax.block_until_ready(reference_forward(params, z))

    assert out.shape == (2, output_dim, input_size, input_size), out.shape
    assert bool(jnp.all(jnp.isfinite(out)))
    max_err = float(jnp.max(jnp.abs(out - ref)))
    assert max_err < 1e-4, f"mismatch vs reference: {max_err}"
    print("KERNEL_OK")
</pallas_src>

<mosaic_0001>
module attributes {stable_mosaic.version = 11 : i64} {
  func.func @_deconv_gn_gelu_kernel(%arg0: i32, %arg1: memref<1x25x32xf32, #tpu.memory_space<vmem>>, %arg2: memref<32x128xf32, #tpu.memory_space<vmem>>, %arg3: memref<25x128xf32, #tpu.memory_space<vmem>>, %arg4: memref<25x128xf32, #tpu.memory_space<vmem>>, %arg5: memref<1x128xf32, #tpu.memory_space<vmem>>, %arg6: memref<1x128xf32, #tpu.memory_space<vmem>>, %arg7: memref<128x16xf32, #tpu.memory_space<vmem>>, %arg8: memref<16x128xf32, #tpu.memory_space<vmem>>, %arg9: memref<1x25x128xf32, #tpu.memory_space<vmem>>) attributes {dimension_semantics = [#tpu.dimension_semantics<parallel>], iteration_bounds = array<i64: 2>, scalar_prefetch = 0 : i64, scratch_operands = 0 : i64, tpu.core_type = #tpu.core_type<tc>, window_params = [{transform_indices = @transform_0, window_bounds = array<i64: 1, 25, 32>}, {pipeline_mode = #tpu.pipeline_mode<synchronous>, transform_indices = @transform_1, window_bounds = array<i64: 32, 128>}, {pipeline_mode = #tpu.pipeline_mode<synchronous>, transform_indices = @transform_2, window_bounds = array<i64: 25, 128>}, {pipeline_mode = #tpu.pipeline_mode<synchronous>, transform_indices = @transform_3, window_bounds = array<i64: 25, 128>}, {pipeline_mode = #tpu.pipeline_mode<synchronous>, transform_indices = @transform_4, window_bounds = array<i64: 1, 128>}, {pipeline_mode = #tpu.pipeline_mode<synchronous>, transform_indices = @transform_5, window_bounds = array<i64: 1, 128>}, {pipeline_mode = #tpu.pipeline_mode<synchronous>, transform_indices = @transform_6, window_bounds = array<i64: 128, 16>}, {pipeline_mode = #tpu.pipeline_mode<synchronous>, transform_indices = @transform_7, window_bounds = array<i64: 16, 128>}, {transform_indices = @transform_8, window_bounds = array<i64: 1, 25, 128>}]} {
    %c0 = arith.constant 0 : index
    %c0_0 = arith.constant 0 : index
    %c0_1 = arith.constant 0 : index
    %0 = vector.load %arg1[%c0, %c0_0, %c0_1] : memref<1x25x32xf32, #tpu.memory_space<vmem>>, vector<1x25x32xf32>
    %1 = vector.shape_cast %0 : vector<1x25x32xf32> to vector<25x32xf32>
    %c0_2 = arith.constant 0 : index
    %c0_3 = arith.constant 0 : index
    %2 = vector.load %arg2[%c0_2, %c0_3] : memref<32x128xf32, #tpu.memory_space<vmem>>, vector<32x128xf32>
    %cst = arith.constant dense<0.000000e+00> : vector<25x128xf32>
    %3 = tpu.matmul %1, %2, %cst {dimension_numbers = #tpu.dot_dimension_numbers<[1], [0], [0], [1], [0, 0, 1, 1], [], []>} : vector<25x32xf32>, vector<32x128xf32>, vector<25x128xf32> -> vector<25x128xf32>
    %c0_4 = arith.constant 0 : index
    %c0_5 = arith.constant 0 : index
    %4 = vector.load %arg3[%c0_4, %c0_5] : memref<25x128xf32, #tpu.memory_space<vmem>>, vector<25x128xf32>
    %5 = arith.addf %3, %4 : vector<25x128xf32>
    %c0_6 = arith.constant 0 : index
    %c0_7 = arith.constant 0 : index
    %6 = vector.load %arg4[%c0_6, %c0_7] : memref<25x128xf32, #tpu.memory_space<vmem>>, vector<25x128xf32>
    %c0_8 = arith.constant 0 : index
    %c0_9 = arith.constant 0 : index
    %7 = vector.load %arg7[%c0_8, %c0_9] : memref<128x16xf32, #tpu.memory_space<vmem>>, vector<128x16xf32>
    %c0_10 = arith.constant 0 : index
    %c0_11 = arith.constant 0 : index
    %8 = vector.load %arg8[%c0_10, %c0_11] : memref<16x128xf32, #tpu.memory_space<vmem>>, vector<16x128xf32>
    %9 = arith.mulf %5, %6 : vector<25x128xf32>
    %cst_12 = arith.constant dense<0.000000e+00> : vector<128xf32>
    %10 = vector.multi_reduction <add>, %9, %cst_12 [0] : vector<25x128xf32> to vector<128xf32>
    %11 = vector.shape_cast %10 : vector<128xf32> to vector<1x128xf32>
    %cst_13 = arith.constant dense<0.000000e+00> : vector<1x16xf32>
    %12 = tpu.matmul %11, %7, %cst_13 {dimension_numbers = #tpu.dot_dimension_numbers<[1], [0], [0], [1], [0, 0, 1, 1], [], []>} : vector<1x128xf32>, vector<128x16xf32>, vector<1x16xf32> -> vector<1x16xf32>
    %cst_14 = arith.constant 7.812500e-03 : f32
    %13 = vector.broadcast %cst_14 : f32 to vector<1x16xf32>
    %14 = arith.mulf %12, %13 : vector<1x16xf32>
    %cst_15 = arith.constant dense<0.000000e+00> : vector<1x128xf32>
    %15 = tpu.matmul %14, %8, %cst_15 {dimension_numbers = #tpu.dot_dimension_numbers<[1], [0], [0], [1], [0, 0, 1, 1], [], []>} : vector<1x16xf32>, vector<16x128xf32>, vector<1x128xf32> -> vector<1x128xf32>
    %16 = vector.broadcast %15 : vector<1x128xf32> to vector<25x128xf32>
    %17 = arith.subf %5, %16 : vector<25x128xf32>
    %18 = arith.mulf %17, %6 : vector<25x128xf32>
    %19 = arith.mulf %18, %18 : vector<25x128xf32>
    %cst_16 = arith.constant dense<0.000000e+00> : vector<128xf32>
    %20 = vector.multi_reduction <add>, %19, %cst_16 [0] : vector<25x128xf32> to vector<128xf32>
    %21 = vector.shape_cast %20 : vector<128xf32> to vector<1x128xf32>
    %cst_17 = arith.constant dense<0.000000e+00> : vector<1x16xf32>
    %22 = tpu.matmul %21, %7, %cst_17 {dimension_numbers = #tpu.dot_dimension_numbers<[1], [0], [0], [1], [0, 0, 1, 1], [], []>} : vector<1x128xf32>, vector<128x16xf32>, vector<1x16xf32> -> vector<1x16xf32>
    %cst_18 = arith.constant 7.812500e-03 : f32
    %23 = vector.broadcast %cst_18 : f32 to vector<1x16xf32>
    %24 = arith.mulf %22, %23 : vector<1x16xf32>
    %cst_19 = arith.constant dense<0.000000e+00> : vector<1x128xf32>
    %25 = tpu.matmul %24, %8, %cst_19 {dimension_numbers = #tpu.dot_dimension_numbers<[1], [0], [0], [1], [0, 0, 1, 1], [], []>} : vector<1x16xf32>, vector<16x128xf32>, vector<1x128xf32> -> vector<1x128xf32>
    %cst_20 = arith.constant 9.99999974E-6 : f32
    %26 = vector.broadcast %cst_20 : f32 to vector<1x128xf32>
    %27 = arith.addf %25, %26 : vector<1x128xf32>
    %28 = math.rsqrt %27 : vector<1x128xf32>
    %29 = vector.broadcast %15 : vector<1x128xf32> to vector<25x128xf32>
    %30 = arith.subf %5, %29 : vector<25x128xf32>
    %31 = vector.broadcast %28 : vector<1x128xf32> to vector<25x128xf32>
    %32 = arith.mulf %30, %31 : vector<25x128xf32>
    %c0_21 = arith.constant 0 : index
    %c0_22 = arith.constant 0 : index
    %33 = vector.load %arg5[%c0_21, %c0_22] : memref<1x128xf32, #tpu.memory_space<vmem>>, vector<1x128xf32>
    %34 = vector.broadcast %33 : vector<1x128xf32> to vector<25x128xf32>
    %35 = arith.mulf %32, %34 : vector<25x128xf32>
    %c0_23 = arith.constant 0 : index
    %c0_24 = arith.constant 0 : index
    %36 = vector.load %arg6[%c0_23, %c0_24] : memref<1x128xf32, #tpu.memory_space<vmem>>, vector<1x128xf32>
    %37 = vector.broadcast %36 : vector<1x128xf32> to vector<25x128xf32>
    %38 = arith.addf %35, %37 : vector<25x128xf32>
    %cst_25 = arith.constant 5.000000e-01 : f32
    %39 = vector.broadcast %cst_25 : f32 to vector<25x128xf32>
    %40 = arith.mulf %39, %38 : vector<25x128xf32>
    %cst_26 = arith.constant 0.707106769 : f32
    %41 = vector.broadcast %cst_26 : f32 to vector<25x128xf32>
    %42 = arith.mulf %38, %41 : vector<25x128xf32>
    %43 = math.erf %42 : vector<25x128xf32>
    %cst_27 = arith.constant 1.000000e+00 : f32
    %44 = vector.broadcast %cst_27 : f32 to vector<25x128xf32>
    %45 = arith.addf %44, %43 : vector<25x128xf32>
    %46 = arith.mulf %40, %45 : vector<25x128xf32>
    %47 = arith.mulf %46, %6 : vector<25x128xf32>
    %c0_28 = arith.constant 0 : index
    %c0_29 = arith.constant 0 : index
    %c0_30 = arith.constant 0 : index
    %48 = vector.load %arg9[%c0_28, %c0_29, %c0_30] : memref<1x25x128xf32, #tpu.memory_space<vmem>>, vector<1x25x128xf32>
    %49 = vector.shape_cast %48 : vector<1x25x128xf32> to vector<25x128xf32>
    %50 = vector.shape_cast %47 : vector<25x128xf32> to vector<1x25x128xf32>
    tpu.vector_store %arg9[%c0_28, %c0_29, %c0_30], %50 {strides = array<i32>} : memref<1x25x128xf32, #tpu.memory_space<vmem>>, vector<1x25x128xf32>,
    return
  }
  func.func @transform_0(%arg0: i32) -> (i32, i32, i32) {
    %c0_i32 = arith.constant 0 : i32
    %c0_i32_0 = arith.constant 0 : i32
    %c0_i32_1 = arith.constant 0 : i32
    return %arg0, %c0_i32, %c0_i32_0 : i32, i32, i32
  }
  func.func @transform_1(%arg0: i32) -> (i32, i32) {
    %c0_i32 = arith.constant 0 : i32
    %c0_i32_0 = arith.constant 0 : i32
    %c0_i32_1 = arith.constant 0 : i32
    return %c0_i32, %c0_i32_0 : i32, i32
  }
  func.func @transform_2(%arg0: i32) -> (i32, i32) {
    %c0_i32 = arith.constant 0 : i32
    %c0_i32_0 = arith.constant 0 : i32
    %c0_i32_1 = arith.constant 0 : i32
    return %c0_i32, %c0_i32_0 : i32, i32
  }
  func.func @transform_3(%arg0: i32) -> (i32, i32) {
    %c0_i32 = arith.constant 0 : i32
    %c0_i32_0 = arith.constant 0 : i32
    %c0_i32_1 = arith.constant 0 : i32
    return %c0_i32, %c0_i32_0 : i32, i32
  }
  func.func @transform_4(%arg0: i32) -> (i32, i32) {
    %c0_i32 = arith.constant 0 : i32
    %c0_i32_0 = arith.constant 0 : i32
    %c0_i32_1 = arith.constant 0 : i32
    return %c0_i32, %c0_i32_0 : i32, i32
  }
  func.func @transform_5(%arg0: i32) -> (i32, i32) {
    %c0_i32 = arith.constant 0 : i32
    %c0_i32_0 = arith.constant 0 : i32
    %c0_i32_1 = arith.constant 0 : i32
    return %c0_i32, %c0_i32_0 : i32, i32
  }
  func.func @transform_6(%arg0: i32) -> (i32, i32) {
    %c0_i32 = arith.constant 0 : i32
    %c0_i32_0 = arith.constant 0 : i32
    %c0_i32_1 = arith.constant 0 : i32
    return %c0_i32, %c0_i32_0 : i32, i32
  }
  func.func @transform_7(%arg0: i32) -> (i32, i32) {
    %c0_i32 = arith.constant 0 : i32
    %c0_i32_0 = arith.constant 0 : i32
    %c0_i32_1 = arith.constant 0 : i32
    return %c0_i32, %c0_i32_0 : i32, i32
  }
  func.func @transform_8(%arg0: i32) -> (i32, i32, i32) {
    %c0_i32 = arith.constant 0 : i32
    %c0_i32_0 = arith.constant 0 : i32
    %c0_i32_1 = arith.constant 0 : i32
    return %arg0, %c0_i32, %c0_i32_0 : i32, i32, i32
  }
}

module attributes {stable_mosaic.version = 11 : i64} {
  func.func @_deconv_sigmoid_kernel(%arg0: i32, %arg1: memref<1x81x128xf32, #tpu.memory_space<vmem>>, %arg2: memref<128x128xf32, #tpu.memory_space<vmem>>, %arg3: memref<81x128xf32, #tpu.memory_space<vmem>>, %arg4: memref<1x81x128xf32, #tpu.memory_space<vmem>>) attributes {dimension_semantics = [#tpu.dimension_semantics<parallel>], iteration_bounds = array<i64: 2>, scalar_prefetch = 0 : i64, scratch_operands = 0 : i64, tpu.core_type = #tpu.core_type<tc>, window_params = [{transform_indices = @transform_0, window_bounds = array<i64: 1, 81, 128>}, {pipeline_mode = #tpu.pipeline_mode<synchronous>, transform_indices = @transform_1, window_bounds = array<i64: 128, 128>}, {pipeline_mode = #tpu.pipeline_mode<synchronous>, transform_indices = @transform_2, window_bounds = array<i64: 81, 128>}, {transform_indices = @transform_3, window_bounds = array<i64: 1, 81, 128>}]} {
    %c0 = arith.constant 0 : index
    %c0_0 = arith.constant 0 : index
    %c0_1 = arith.constant 0 : index
    %0 = vector.load %arg1[%c0, %c0_0, %c0_1] : memref<1x81x128xf32, #tpu.memory_space<vmem>>, vector<1x81x128xf32>
    %1 = vector.shape_cast %0 : vector<1x81x128xf32> to vector<81x128xf32>
    %c0_2 = arith.constant 0 : index
    %c0_3 = arith.constant 0 : index
    %2 = vector.load %arg2[%c0_2, %c0_3] : memref<128x128xf32, #tpu.memory_space<vmem>>, vector<128x128xf32>
    %cst = arith.constant dense<0.000000e+00> : vector<81x128xf32>
    %3 = tpu.matmul %1, %2, %cst {dimension_numbers = #tpu.dot_dimension_numbers<[1], [0], [0], [1], [0, 0, 1, 1], [], []>} : vector<81x128xf32>, vector<128x128xf32>, vector<81x128xf32> -> vector<81x128xf32>
    %c0_4 = arith.constant 0 : index
    %c0_5 = arith.constant 0 : index
    %4 = vector.load %arg3[%c0_4, %c0_5] : memref<81x128xf32, #tpu.memory_space<vmem>>, vector<81x128xf32>
    %5 = arith.addf %3, %4 : vector<81x128xf32>
    %6 = arith.negf %5 : vector<81x128xf32>
    %7 = math.exp %6 : vector<81x128xf32>
    %cst_6 = arith.constant 1.000000e+00 : f32
    %8 = vector.broadcast %cst_6 : f32 to vector<81x128xf32>
    %9 = arith.addf %8, %7 : vector<81x128xf32>
    %10 = arith.divf %8, %9 : vector<81x128xf32>
    %c0_7 = arith.constant 0 : index
    %c0_8 = arith.constant 0 : index
    %c0_9 = arith.constant 0 : index
    %11 = vector.load %arg4[%c0_7, %c0_8, %c0_9] : memref<1x81x128xf32, #tpu.memory_space<vmem>>, vector<1x81x128xf32>
    %12 = vector.shape_cast %11 : vector<1x81x128xf32> to vector<81x128xf32>
    %13 = vector.shape_cast %10 : vector<81x128xf32> to vector<1x81x128xf32>
    tpu.vector_store %arg4[%c0_7, %c0_8, %c0_9], %13 {strides = array<i32>} : memref<1x81x128xf32, #tpu.memory_space<vmem>>, vector<1x81x128xf32>,
    return
  }
  func.func @transform_0(%arg0: i32) -> (i32, i32, i32) {
    %c0_i32 = arith.constant 0 : i32
    %c0_i32_0 = arith.constant 0 : i32
    %c0_i32_1 = arith.constant 0 : i32
    return %arg0, %c0_i32, %c0_i32_0 : i32, i32, i32
  }
  func.func @transform_1(%arg0: i32) -> (i32, i32) {
    %c0_i32 = arith.constant 0 : i32
    %c0_i32_0 = arith.constant 0 : i32
    %c0_i32_1 = arith.constant 0 : i32
    return %c0_i32, %c0_i32_0 : i32, i32
  }
  func.func @transform_2(%arg0: i32) -> (i32, i32) {
    %c0_i32 = arith.constant 0 : i32
    %c0_i32_0 = arith.constant 0 : i32
    %c0_i32_1 = arith.constant 0 : i32
    return %c0_i32, %c0_i32_0 : i32, i32
  }
  func.func @transform_3(%arg0: i32) -> (i32, i32, i32) {
    %c0_i32 = arith.constant 0 : i32
    %c0_i32_0 = arith.constant 0 : i32
    %c0_i32_1 = arith.constant 0 : i32
    return %arg0, %c0_i32, %c0_i32_0 : i32, i32, i32
  }
}

</mosaic_0001>

<bundles_post_ra>
// kernel: tile.23
= control target key start
LH: loop header
LB: loop body
LE: loop exit
PB: predicated region body
PF: predicated region fallthrough
CT: control target
= control target key end

     0   :  { %s22_s0 = inlined_call_operand.vmem [shape: f32[32], index: 0, kind: input, shape index: {}]   ;;  %s23_s1 = inlined_call_operand.vmem [shape: f32[4,32], index: 1, kind: output, shape index: {}]  }
   0x1   :  { %v4_v0 = vld [vmem:[%s22_s0] ss:$0 sm:$0xff] }
   0x2   :  { %5 = vst [vmem:[%s23_s1] sm:$0xf] %v4_v0 }

// kernel: tile.29
= control target key start
LH: loop header
LB: loop body
LE: loop exit
PB: predicated region body
PF: predicated region fallthrough
CT: control target
= control target key end

     0   :  { %vm7_vm0 = vcmask 261120   ;;  %s37_s8 = smov 32   ;;  %s38_s9 = smov 64   ;;  %vm13_vm1 = vcmask 1048320   ;;  %vm19_vm2 = vcmask 785920   ;;  %vm25_vm3 = vcmask 523520   ;;  %s55_s0 = inlined_call_operand.vmem [shape: f32[4,32], index: 0, kind: input, shape index: {}]   ;;  %s56_s1 = inlined_call_operand.vmem [shape: f32[1,128], index: 1, kind: output, shape index: {}]  }
   0x1   :  { %v4_v0 = vld [vmem:[%s55_s0] sm:$0xf]  ;;  %s36_s0 = smov 96  }
   0x2   :  { %5 = vst [vmem:[#allocation1] sm:$0xf] %v4_v0 }
   0x9   :  { %v10_v1 = vld [vmem:[#allocation1 + $0x3] sm:$0x1]   ;;  %v22_v2 = vld [vmem:[#allocation1 + $0x1] sm:$0x1]   ;;  %v6_v3 = vld [vmem:[#allocation1] sm:$0x1]  }
   0xa   :  { %11 = vrot.lane.b32.xlu0 %v10_v1, %s36_s0  ;;  %23 = vrot.lane.b32.xlu1 %v22_v2, %s37_s8  ;;  %v16_v4 = vld [vmem:[#allocation1 + $0x2] sm:$0x1]   ;;  %8 = vst.msk [vmem:[#allocation0] sm:$0x1] %vm7_vm0, %v6_v3  }
   0xe   :  { %17 = vrot.lane.b32.xlu0 %v16_v4, %s38_s9 }
  0x7c   :  { %v12_v5 = vpop.permute.xlu0 %11   ;;  %v24_v6 = vpop.permute.xlu1 %23  }
  0x7d   :  { %14 = vst.msk [vmem:[#allocation0] sm:$0x1] %vm13_vm1, %v12_v5  }
  0x80   :  { %v18_v7 = vpop.permute.xlu0 %17  }
  0x81   :  { %20 = vst.msk [vmem:[#allocation0] sm:$0x1] %vm19_vm2, %v18_v7  }
  0x82   :  { %26 = vst.msk [vmem:[#allocation0] sm:$0x1] %vm25_vm3, %v24_v6  }
  0x89   :  { %v30_v8 = vld [vmem:[#allocation0] sm:$0x1] }
  0x8a   :  { %32 = vst [vmem:[%s56_s1] sm:$0x1] %v30_v8 }

// kernel: tile.38
= control target key start
LH: loop header
LB: loop body
LE: loop exit
PB: predicated region body
PF: predicated region fallthrough
CT: control target
= control target key end

     0   :  { %s22_s0 = inlined_call_operand.vmem [shape: f32[3], index: 0, kind: input, shape index: {}]   ;;  %s23_s1 = inlined_call_operand.vmem [shape: f32[4,3], index: 1, kind: output, shape index: {}]  }
   0x1   :  { %v4_v0 = vld [vmem:[%s22_s0] ss:$0 sm:$0xff] }
   0x2   :  { %5 = vst [vmem:[%s23_s1] sm:$0xf] %v4_v0 }

// kernel: decoder_forward.2
= control target key start
LH: loop header
LB: loop body
LE: loop exit
PB: predicated region body
PF: predicated region fallthrough
CT: control target
= control target key end

     0   :  { %s1188_s27 = smov 0   ;;  %s1358_s0 = inlined_call_operand.vmem [shape: f32[2,25,32], index: 0, kind: input, shape index: {}]   ;;  %s1359_s1 = inlined_call_operand.vmem [shape: f32[32,128], index: 1, kind: input, shape index: {}]   ;;  %s1360_s2 = inlined_call_operand.vmem [shape: f32[25,128], index: 2, kind: input, shape index: {}]   ;;  %s1361_s3 = inlined_call_operand.vmem [shape: f32[25,128], index: 3, kind: input, shape index: {}]   ;;  %s1362_s4 = inlined_call_operand.vmem [shape: f32[1,128], index: 4, kind: input, shape index: {}]   ;;  %s1363_s5 = inlined_call_operand.vmem [shape: f32[1,128], index: 5, kind: input, shape index: {}]   ;;  %s1364_s6 = inlined_call_operand.vmem [shape: f32[128,16], index: 6, kind: input, shape index: {}]   ;;  %s1365_s7 = inlined_call_operand.vmem [shape: f32[16,128], index: 7, kind: input, shape index: {}]   ;;  %s1366_s8 = inlined_call_operand.vmem [shape: f32[2,25,128], index: 8, kind: output, shape index: {}]  }
   0x1 LB: > { %s882_s28 = sadd.s32 4294967295, %s1138_s27   ;;  %p886_p0 = scmp.ge.s32.totalorder %s1138_s27, 1  ;;  %s1138_s27 = sphi %s1188_s27, %s18_s27  }
   0x2   : > { %p262_p1 = scmp.lt.s32.totalorder %s1138_s27, 3 }
   0x4   : > { %p263_p2 = pnand %p886_p0, %p262_p1 }
   0x5   : > { %v310_v0 = vld [vmem:[%s1359_s1] sm:$0xff] (!%p263_p2)  ;;  %v311_v1 = vld [vmem:[%s1359_s1 + $0x8] sm:$0xff] (!%p263_p2)  ;;  %v312_v2 = vld [vmem:[%s1359_s1 + $0x10] sm:$0xff] (!%p263_p2)  ;;  %p296_p3 = scmp.lt.s32.totalorder (!%p263_p2), %s882_s28, 1  ;;  %v1140_v5 = vmov (!%p263_p2), 0.0|0.0   ;;  %vm318_vm0 = vcmask (!%p263_p2), 261120  }
   0x6   : > { %266 = sbr.rel (%p263_p2) target bundleno = 1177 (0x499), region = 52  ;;  %v1049_v3 = vpack.c.bf16 (!%p263_p2), %v311_v1, %v310_v0  ;;  %v313_v4 = vld [vmem:[%s1359_s1 + $0x18] sm:$0xff] (!%p263_p2)  ;;  %1057 = vmatprep.subr.bf16.mxu1 (!%p263_p2), %v1140_v5  ;;  %v420_v6 = vld [vmem:[%s1364_s6] sm:$0xff] (!%p263_p2)  ;;  %v421_v7 = vld [vmem:[%s1364_s6 + $0x8] sm:$0xff] (!%p263_p2)  ;;  %vm1141_vm1 = vmmov (!%p263_p2), 0   ;;  %v1142_v32 = vmov (!%p263_p2), 0.0  }
   0x7   : > { %v1053_v8 = vpack.c.bf16 (!%p263_p2), %v313_v4, %v312_v2  ;;  %v1058_v9 = vpack.c.bf16 (!%p263_p2), %v421_v7, %v420_v6  ;;  %v422_v10 = vld [vmem:[%s1364_s6 + $0x10] sm:$0xff] (!%p263_p2)  ;;  %v423_v11 = vld [vmem:[%s1364_s6 + $0x18] sm:$0xff] (!%p263_p2)  ;;  %v424_v17 = vld [vmem:[%s1364_s6 + $0x20] sm:$0xff] (!%p263_p2)  ;;  %997 = vmatprep.mubr.msk.f32.mxu1 (!%p263_p2), %vm1141_vm1, %v1142_v32  ;;  %vm444_vm2 = vcmask (!%p263_p2), 1040384   ;;  %vm524_vm3 = vcmask (!%p263_p2), 130048  }
   0x8   : > { %1050 = vmatprep.subr.bf16.mxu0 (!%p263_p2), %v1049_v3  ;;  %v1061_v12 = vpack.c.bf16 (!%p263_p2), %v423_v11, %v422_v10  ;;  %v425_v18 = vld [vmem:[%s1364_s6 + $0x28] sm:$0xff] (!%p263_p2)  ;;  %v426_v20 = vld [vmem:[%s1364_s6 + $0x30] sm:$0xff] (!%p263_p2)  ;;  %v427_v21 = vld [vmem:[%s1364_s6 + $0x38] sm:$0xff] (!%p263_p2) }
   0x9   : > { %1052 = vmatpush3.bf16.msra.mxu0 (!%p263_p2), %v1049_v3  ;;  %1059 = vmatpush3.bf16.msra.mxu1 (!%p263_p2), %v1058_v9  ;;  %v1064_v19 = vpack.c.bf16 (!%p263_p2), %v425_v18, %v424_v17  ;;  %v1067_v22 = vpack.c.bf16 (!%p263_p2), %v427_v21, %v426_v20  ;;  %v428_v23 = vld [vmem:[%s1364_s6 + $0x40] sm:$0xff] (!%p263_p2)  ;;  %v429_v24 = vld [vmem:[%s1364_s6 + $0x48] sm:$0xff] (!%p263_p2)  ;;  %v430_v26 = vld [vmem:[%s1364_s6 + $0x50] sm:$0xff] (!%p263_p2) }
   0xa   : > { %1054 = vmatprep.subr.bf16.mxu0 (!%p263_p2), %v1053_v8  ;;  %1060 = vmatprep.subr.bf16.mxu1 (!%p263_p2), %v1140_v5  ;;  %v1070_v25 = vpack.c.bf16 (!%p263_p2), %v429_v24, %v428_v23  ;;  %v431_v27 = vld [vmem:[%s1364_s6 + $0x58] sm:$0xff] (!%p263_p2)  ;;  %v432_v29 = vld [vmem:[%s1364_s6 + $0x60] sm:$0xff] (!%p263_p2)  ;;  %v433_v30 = vld [vmem:[%s1364_s6 + $0x68] sm:$0xff] (!%p263_p2) }
   0xb   : > { %v1073_v28 = vpack.c.bf16 (!%p263_p2), %v431_v27, %v430_v26  ;;  %v1076_v31 = vpack.c.bf16 (!%p263_p2), %v433_v30, %v432_v29  ;;  %v434_v33 = vld [vmem:[%s1364_s6 + $0x70] sm:$0xff] (!%p263_p2)  ;;  %v435_v34 = vld [vmem:[%s1364_s6 + $0x78] sm:$0xff] (!%p263_p2)  ;;  %v315_v36 = vld [vmem:[%s1360_s2 + $0x8] sm:$0xff] (!%p263_p2) }
   0xc   : > { %v1079_v35 = vpack.c.bf16 (!%p263_p2), %v435_v34, %v434_v33  ;;  %v314_v37 = vld [vmem:[%s1360_s2] sm:$0xff] (!%p263_p2)  ;;  %v1296_v40 = vld [vmem:[%s1361_s3 + $0x8] sm:$0xff] (!%p263_p2)  ;;  %v317_v44 = vld [vmem:[%s1360_s2 + $0x18] sm:$0x1] (!%p263_p2) }
   0xd   : > { %s1368_s28 = smov (!%p296_p3, %s882_s28), 1  ;;  %1056 = vmatpush3.bf16.msra.mxu0 %v1053_v8  ;;  %1062 = vmatpush3.bf16.msra.mxu1 %v1061_v12  ;;  %v1301_v42 = vld [vmem:[%s1361_s3] sm:$0xff]  ;;  %v316_v45 = vld [vmem:[%s1360_s2 + $0x10] sm:$0xff]  ;;  %v1314_v49 = vld [vmem:[%s1361_s3 + $0x18] sm:$0x1] }
   0xe   : > { %s901_s23 = sshll.u32 %s1368_s28, 5  ;;  %1063 = vmatprep.subr.bf16.mxu1 %v1140_v5  ;;  %1084 = vmatprep.subr.bf16.mxu0 %v1140_v5  ;;  %v1319_v52 = vld [vmem:[%s1361_s3 + $0x10] sm:$0xff]  ;;  %v436_v0 = vld [vmem:[%s1365_s7] sm:$0xff]  ;;  %v437_v1 = vld [vmem:[%s1365_s7 + $0x8] sm:$0xff] }
   0xf   : > { %s300_s26 = scalar_lea.vmem %s1358_s0, %s901_s23  ;;  %v1082_v3 = vpack.c.bf16 %v437_v1, %v436_v0  ;;  %s305_s19 = scalar_lea.vmem %s1366_s8, %s901_s23 }
  0x10   : > { %v306_v13 = vld [vmem:[%s300_s26] sm:$0xff]  ;;  %v307_v14 = vld [vmem:[%s300_s26 + $0x8] sm:$0xff]  ;;  %v308_v15 = vld [vmem:[%s300_s26 + $0x10] sm:$0xff] }
  0x11   : > { %959 = vmatprep.mubr.msk.f32.mxu0 %vm318_vm0, %v306_v13  ;;  %v309_v16 = vld [vmem:[%s300_s26 + $0x18] sm:$0x1]  ;;  %1065 = vmatpush3.bf16.msra.mxu1 %v1064_v19 }
  0x12   : > { %960 = vmatmul.mubr.msk.f32.vlgmr.msra.gmra.mrb[0].mxu0 %vm318_vm0, %v307_v14  ;;  %1066 = vmatprep.subr.bf16.mxu1 %v1140_v5 }
  0x13   : > { %962 = vmatprep.mubr.msk.f32.mxu0 %vm318_vm0, %v308_v15  ;;  %1086 = vmatpush3.bf16.msra.mxu0 %v1058_v9  ;;  %v598_v9 = vlaneseq }
  0x14   : > { %1087 = vmatprep.subr.bf16.mxu0 %v1140_v5 }
  0x15   : > { %1068 = vmatpush3.bf16.msra.mxu1 %v1067_v22  ;;  %v599_v10 = vshrl.u32 %v598_v9, 7 }
  0x16   : > { %963 = vmatmul.mubr.msk.f32.gmra.mrb[2].mxu0 %vm318_vm0, %v309_v16  ;;  %1069 = vmatprep.subr.bf16.mxu1 %v1140_v5 }
  0x17   : > { %1089 = vmatpush3.bf16.msra.mxu0 %v1061_v12  ;;  %1039 = vmatprep.mubr.msk.f32.mxu0 %vm1141_vm1, %v1142_v32  ;;  %v600_v11 = vsub.s32 0, %v599_v10 }
  0x18   : > { %1090 = vmatprep.subr.bf16.mxu0 %v1140_v5 }
  0x19   : > { %1071 = vmatpush3.bf16.msra.mxu1 %v1070_v25 }
  0x1a   : > { %1072 = vmatprep.subr.bf16.mxu1 %v1140_v5 }
  0x1b   : > { %1092 = vmatpush3.bf16.msra.mxu0 %v1064_v19 }
  0x1c   : > { %1093 = vmatprep.subr.bf16.mxu0 %v1140_v5 }
  0x1d   : > { %1074 = vmatpush3.bf16.msra.mxu1 %v1073_v28 }
  0x1e   : > { %1075 = vmatprep.subr.bf16.mxu1 %v1140_v5 }
  0x1f   : > { %1095 = vmatpush3.bf16.msra.mxu0 %v1067_v22 }
  0x20   : > { %1096 = vmatprep.subr.bf16.mxu0 %v1140_v5 }
  0x21   : > { %1077 = vmatpush3.bf16.msra.mxu1 %v1076_v31 }
  0x22   : > { %1078 = vmatprep.subr.bf16.mxu1 %v1140_v5 }
  0x23   : > { %1098 = vmatpush3.bf16.msra.mxu0 %v1070_v25 }
  0x24   : > { %1099 = vmatprep.subr.bf16.mxu0 %v1140_v5 }
  0x25   : > { %1080 = vmatpush3.bf16.msra.mxu1 %v1079_v35 }
  0x26   : > { %1081 = vmatprep.subr.bf16.mxu1 %v1140_v5 }
  0x27   : > { %1101 = vmatpush3.bf16.msra.mxu0 %v1073_v28 }
  0x28   : > { %1102 = vmatprep.subr.bf16.mxu0 %v1140_v5 }
  0x2b   : > { %1104 = vmatpush3.bf16.msra.mxu0 %v1076_v31 }
  0x2c   : > { %1105 = vmatprep.subr.bf16.mxu0 %v1140_v5 }
  0x2f   : > { %1107 = vmatpush3.bf16.msra.mxu0 %v1079_v35 }
  0xe5   : > { %v961_v38 = vpop.f32.mrb[0].mxu0 }
  0xe6   : > { %v403_v39 = vadd.f32 %v961_v38, %v315_v36  ;;  %v397_v41 = vpop.f32.mrb[1].mxu0 }
  0xe7   : > { %v398_v43 = vadd.f32 %v397_v41, %v314_v37 }
  0xe8   : > { %v439_v46 = vmul.f32 %v1296_v40, %v403_v39 }
  0xe9   : > { %v438_v47 = vmul.f32 %v1301_v42, %v398_v43  ;;  %v964_v48 = vpop.f32.mrb[2].mxu0 }
  0xea   : > { %v413_v50 = vadd.f32 %v964_v48, %v317_v44  ;;  %v407_v51 = vpop.f32.mrb[3].mxu0 }
  0xeb   : > { %v408_v53 = vadd.f32 %v407_v51, %v316_v45  ;;  %v442_v55 = vadd.f32 %v439_v46, %v438_v47  ;;  %v897_v46 = vld [vmem:[%s1362_s4] ss:$0 sm:$0xff] }
  0xec   : > { %v441_v54 = vmul.f32 %v1314_v49, %v413_v50 }
  0xed   : > { %v440_v56 = vmul.f32 %v1319_v52, %v408_v53 }
  0xee   : > { %v445_v58 = vsel %vm444_vm2, %v441_v54, 0.0 }
  0xef   : > { %v443_v57 = vadd.f32 %v442_v55, %v440_v56 }
  0xf1   : > { %v446_v59 = vadd.f32 %v445_v58, %v443_v57 }
  0xf3   : > { %v447_v60 = vrot.slane %v446_v59, 4 }
  0xf5   : > { %v448_v61 = vadd.f32 %v447_v60, %v446_v59 }
  0xf7   : > { %v449_v62 = vrot.slane %v448_v61, 2 }
  0xf9   : > { %v450_v63 = vadd.f32 %v449_v62, %v448_v61 }
  0xfb   : > { %v451_v2 = vrot.slane %v450_v63, 1 }
  0xfd   : > { %v452_v4 = vadd.f32 %v451_v2, %v450_v63 }
  0xff   : > { %998 = vmatmul.mubr.f32.vlgmr.msra.gmra.mrb[0].mxu1 %v452_v4 }
 0x100   : > { %1083 = vmatpush3.bf16.msra.mxu1 %v1082_v3  ;;  %1004 = vmatprep.mubr.msk.f32.mxu1 %vm1141_vm1, %v1142_v32 }
 0x101   : > { %1108 = vmatprep.subr.bf16.mxu1 %v1140_v5 }
 0x1d2   : > { %v519_v6 = vpop.f32.mrb[0].mxu1 }
 0x1d3   : > { %v523_v7 = vmul.f32 0.0078125, %v519_v6  ;;  %v999_v8 = vpop.f32.mrb[1].mxu1 }
 0x1d5   : > { %1005 = vmatmul.mubr.msk.f32.vlgmr.msra.gmra.mrb[2].mxu1 %vm524_vm3, %v523_v7 }
 0x1d6   : > { %1110 = vmatpush3.bf16.msra.mxu1 %v1082_v3  ;;  %1046 = vmatprep.mubr.msk.f32.mxu1 %vm1141_vm1, %v1142_v32 }
 0x2a8   : > { %v594_v12 = vpop.f32.mrb[2].mxu1 }
 0x2a9   : > { %v601_v13 = vrot.slane %v594_v12, %v600_v11  ;;  %v1006_v14 = vpop.f32.mrb[3].mxu1 }
 0x2ab   : > { %v602_v15 = vsub.f32 %v398_v43, %v601_v13  ;;  %v603_v16 = vsub.f32 %v403_v39, %v601_v13  ;;  %v604_v17 = vsub.f32 %v408_v53, %v601_v13  ;;  %v605_v18 = vsub.f32 %v413_v50, %v601_v13  ;;  %v898_v53 = vld [vmem:[%s1363_s5] ss:$0 sm:$0xff] }
 0x2ad   : > { %v606_v5 = vmul.f32 %v602_v15, %v1301_v42  ;;  %v607_v19 = vmul.f32 %v603_v16, %v1296_v40  ;;  %v608_v20 = vmul.f32 %v604_v17, %v1319_v52  ;;  %v609_v21 = vmul.f32 %v605_v18, %v1314_v49 }
 0x2af   : > { %v610_v22 = vmul.f32 %v606_v5, %v606_v5  ;;  %v611_v23 = vmul.f32 %v607_v19, %v607_v19  ;;  %v613_v24 = vmul.f32 %v609_v21, %v609_v21  ;;  %v612_v25 = vmul.f32 %v608_v20, %v608_v20 }
 0x2b1   : > { %v614_v26 = vadd.f32 %v611_v23, %v610_v22  ;;  %v616_v28 = vsel %vm444_vm2, %v613_v24, 0.0 }
 0x2b3   : > { %v615_v27 = vadd.f32 %v614_v26, %v612_v25 }
 0x2b5   : > { %v617_v29 = vadd.f32 %v616_v28, %v615_v27 }
 0x2b7   : > { %v618_v30 = vrot.slane %v617_v29, 4 }
 0x2b9   : > { %v619_v31 = vadd.f32 %v618_v30, %v617_v29 }
 0x2bb   : > { %v620_v32 = vrot.slane %v619_v31, 2 }
 0x2bd   : > { %v621_v33 = vadd.f32 %v620_v32, %v619_v31 }
 0x2bf   : > { %v622_v34 = vrot.slane %v621_v33, 1 }
 0x2c1   : > { %v623_v35 = vadd.f32 %v622_v34, %v621_v33 }
 0x2c3   : > { %1040 = vmatmul.mubr.f32.vlgmr.msra.gmra.mrb[4].mxu0 %v623_v35 }
 0x396   : > { %v690_v36 = vpop.f32.mrb[4].mxu0 }
 0x397   : > { %v694_v37 = vmul.f32 0.0078125, %v690_v36  ;;  %v1041_v38 = vpop.f32.mrb[5].mxu0 }
 0x399   : > { %1047 = vmatmul.mubr.msk.f32.vlgmr.msra.gmra.mrb[4].mxu1 %vm524_vm3, %v694_v37 }
 0x46c   : > { %v764_v39 = vpop.f32.mrb[4].mxu1 }
 0x46d   : > { %v765_v41 = vadd.f32 1e-05, %v764_v39  ;;  %v1048_v43 = vpop.f32.mrb[5].mxu1 }
 0x46f   : > { %1122 = vrsqrt.f32 %v765_v41 }
 0x479   : > { %v1123_v44 = vpop.eup %1122 }
 0x47a   : > { %v772_v45 = vrot.slane %v1123_v44, %v600_v11 }
 0x47c   : > { %v773_v47 = vmul.f32 %v772_v45, %v602_v15  ;;  %v774_v48 = vmul.f32 %v772_v45, %v603_v16  ;;  %v775_v50 = vmul.f32 %v772_v45, %v604_v17  ;;  %v776_v51 = vmul.f32 %v772_v45, %v605_v18 }
 0x47e   : > { %v784_v54 = vmul.f32 %v897_v46, %v773_v47  ;;  %v785_v55 = vmul.f32 %v897_v46, %v774_v48  ;;  %v786_v56 = vmul.f32 %v897_v46, %v775_v50  ;;  %v787_v57 = vmul.f32 %v897_v46, %v776_v51 }
 0x480   : > { %v795_v58 = vadd.f32 %v898_v53, %v784_v54  ;;  %v796_v59 = vadd.f32 %v898_v53, %v785_v55  ;;  %v797_v60 = vadd.f32 %v898_v53, %v786_v56  ;;  %v798_v61 = vadd.f32 %v898_v53, %v787_v57 }
 0x482   : > { %v803_v62 = vmul.f32 0.70710677, %v795_v58  ;;  %v804_v63 = vmul.f32 0.70710677, %v796_v59  ;;  %v805_v0 = vmul.f32 0.70710677, %v797_v60 }
 0x483   : > { %v806_v1 = vmul.f32 0.70710677, %v798_v61  ;;  %v799_v4 = vmul.f32 0.5, %v795_v58  ;;  %v800_v8 = vmul.f32 0.5, %v796_v59  ;;  %v801_v11 = vmul.f32 0.5, %v797_v60 }
 0x484   : > { %1124 = verf.f32 %v803_v62  ;;  %v802_v14 = vmul.f32 0.5, %v798_v61 }
 0x485   : > { %1126 = verf.f32 %v804_v63 }
 0x486   : > { %1128 = verf.f32 %v805_v0 }
 0x487   : > { %1130 = verf.f32 %v806_v1 }
 0x48e   : > { %v1125_v2 = vpop.eup %1124 }
 0x48f   : > { %v1127_v3 = vpop.eup %1126  ;;  %v811_v6 = vadd.f32 1.0, %v1125_v2 }
 0x490   : > { %v1129_v7 = vpop.eup %1128  ;;  %v812_v9 = vadd.f32 1.0, %v1127_v3 }
 0x491   : > { %v1131_v10 = vpop.eup %1130  ;;  %v813_v12 = vadd.f32 1.0, %v1129_v7  ;;  %v815_v13 = vmul.f32 %v811_v6, %v799_v4 }
 0x492   : > { %v814_v15 = vadd.f32 1.0, %v1131_v10  ;;  %v816_v16 = vmul.f32 %v812_v9, %v800_v8 }
 0x493   : > { %v817_v17 = vmul.f32 %v813_v12, %v801_v11  ;;  %v819_v18 = vmul.f32 %v815_v13, %v1301_v42 }
 0x494   : > { %v818_v5 = vmul.f32 %v814_v15, %v802_v14  ;;  %v820_v19 = vmul.f32 %v816_v16, %v1296_v40 }
 0x495   : > { %v821_v20 = vmul.f32 %v817_v17, %v1319_v52  ;;  %823 = vst [vmem:[%s305_s19] sm:$0xff] %v819_v18 }
 0x496   : > { %v822_v21 = vmul.f32 %v818_v5, %v1314_v49  ;;  %824 = vst [vmem:[%s305_s19 + $0x8] sm:$0xff] %v820_v19 }
 0x497   : > { %825 = vst [vmem:[%s305_s19 + $0x10] sm:$0xff] %v821_v20 }
 0x498   : > { %826 = vst [vmem:[%s305_s19 + $0x18] sm:$0x1] %v822_v21 }
 0x499 PF: > { %s18_s27 = sadd.s32 1, %s1138_s27  }
 0x49a   : > { %p15_p4 = scmp.ge.s32.totalorder %s18_s27, 4  }
 0x49c   :  { %17 = sbr.rel (!%p15_p4) target bundleno = 1 (0x1), region = 82 }

// kernel: decoder_forward.3
= control target key start
LH: loop header
LB: loop body
LE: loop exit
PB: predicated region body
PF: predicated region fallthrough
CT: control target
= control target key end

     0   :  { %s700_s12 = smov 0   ;;  %s857_s0 = inlined_call_operand.vmem [shape: f32[2,81,128], index: 0, kind: input, shape index: {}]   ;;  %s858_s1 = inlined_call_operand.vmem [shape: f32[128,128], index: 1, kind: input, shape index: {}]   ;;  %s859_s2 = inlined_call_operand.vmem [shape: f32[81,128], index: 2, kind: input, shape index: {}]   ;;  %s860_s3 = inlined_call_operand.vmem [shape: f32[2,81,128], index: 3, kind: output, shape index: {}]  }
   0x1 LB: > { %s461_s13 = sadd.s32 4294967295, %s675_s12   ;;  %p465_p0 = scmp.ge.s32.totalorder %s675_s12, 1  ;;  %s675_s12 = sphi %s700_s12, %s13_s12  }
   0x2   : > { %p137_p1 = scmp.lt.s32.totalorder %s675_s12, 3 }
   0x4   : > { %p138_p2 = pnand %p465_p0, %p137_p1 }
   0x5   : > { %v182_v0 = vld [vmem:[%s858_s1] sm:$0xff] (!%p138_p2)  ;;  %v183_v1 = vld [vmem:[%s858_s1 + $0x8] sm:$0xff] (!%p138_p2)  ;;  %v184_v2 = vld [vmem:[%s858_s1 + $0x10] sm:$0xff] (!%p138_p2)  ;;  %v677_v3 = vmov (!%p138_p2), 0.0|0.0   ;;  %vm678_vm0 = vmmov (!%p138_p2), 0   ;;  %v679_v6 = vmov (!%p138_p2), 0.0  }
   0x6   : > { %141 = sbr.rel (%p138_p2) target bundleno = 300 (0x12c), region = 32  ;;  %573 = vmatprep.subr.bf16.mxu0 (!%p138_p2), %v677_v3  ;;  %v574_v4 = vpack.c.bf16 (!%p138_p2), %v183_v1, %v182_v0  ;;  %597 = vmatprep.subr.bf16.mxu1 (!%p138_p2), %v677_v3  ;;  %v185_v5 = vld [vmem:[%s858_s1 + $0x18] sm:$0xff] (!%p138_p2)  ;;  %v186_v8 = vld [vmem:[%s858_s1 + $0x20] sm:$0xff] (!%p138_p2)  ;;  %v187_v9 = vld [vmem:[%s858_s1 + $0x28] sm:$0xff] (!%p138_p2)  ;;  %p161_p3 = scmp.lt.s32.totalorder (!%p138_p2), %s461_s13, 1 }
   0x7   : > { %540 = vmatprep.mubr.msk.f32.mxu0 (!%p138_p2), %vm678_vm0, %v679_v6  ;;  %558 = vmatprep.mubr.msk.f32.mxu1 (!%p138_p2), %vm678_vm0, %v679_v6  ;;  %v577_v7 = vpack.c.bf16 (!%p138_p2), %v185_v5, %v184_v2  ;;  %v580_v10 = vpack.c.bf16 (!%p138_p2), %v187_v9, %v186_v8  ;;  %v188_v11 = vld [vmem:[%s858_s1 + $0x30] sm:$0xff] (!%p138_p2)  ;;  %v189_v12 = vld [vmem:[%s858_s1 + $0x38] sm:$0xff] (!%p138_p2)  ;;  %v190_v14 = vld [vmem:[%s858_s1 + $0x40] sm:$0xff] (!%p138_p2) }
   0x8   : > { %575 = vmatpush3.bf16.msra.mxu0 (!%p138_p2), %v574_v4  ;;  %605 = vmatpush3.bf16.msra.mxu1 (!%p138_p2), %v574_v4  ;;  %v583_v13 = vpack.c.bf16 (!%p138_p2), %v189_v12, %v188_v11  ;;  %v191_v15 = vld [vmem:[%s858_s1 + $0x48] sm:$0xff] (!%p138_p2)  ;;  %v192_v17 = vld [vmem:[%s858_s1 + $0x50] sm:$0xff] (!%p138_p2)  ;;  %v193_v18 = vld [vmem:[%s858_s1 + $0x58] sm:$0xff] (!%p138_p2) }
   0x9   : > { %576 = vmatprep.subr.bf16.mxu0 (!%p138_p2), %v677_v3  ;;  %598 = vmatprep.subr.bf16.mxu1 (!%p138_p2), %v677_v3  ;;  %v586_v16 = vpack.c.bf16 (!%p138_p2), %v191_v15, %v190_v14  ;;  %v589_v19 = vpack.c.bf16 (!%p138_p2), %v193_v18, %v192_v17  ;;  %v194_v20 = vld [vmem:[%s858_s1 + $0x60] sm:$0xff] (!%p138_p2)  ;;  %v195_v21 = vld [vmem:[%s858_s1 + $0x68] sm:$0xff] (!%p138_p2)  ;;  %v196_v23 = vld [vmem:[%s858_s1 + $0x70] sm:$0xff] (!%p138_p2) }
   0xa   : > { %v592_v22 = vpack.c.bf16 (!%p138_p2), %v195_v21, %v194_v20  ;;  %v197_v24 = vld [vmem:[%s858_s1 + $0x78] sm:$0xff] (!%p138_p2)  ;;  %v198_v37 = vld [vmem:[%s859_s2] sm:$0xff] (!%p138_p2)  ;;  %v204_v38 = vld [vmem:[%s859_s2 + $0x30] sm:$0xff] (!%p138_p2) }
   0xb   : > { %v595_v25 = vpack.c.bf16 (!%p138_p2), %v197_v24, %v196_v23  ;;  %v199_v45 = vld [vmem:[%s859_s2 + $0x8] sm:$0xff] (!%p138_p2)  ;;  %v205_v46 = vld [vmem:[%s859_s2 + $0x38] sm:$0xff] (!%p138_p2)  ;;  %v200_v55 = vld [vmem:[%s859_s2 + $0x10] sm:$0xff] (!%p138_p2) }
   0xc   : > { %578 = vmatpush3.bf16.msra.mxu0 (!%p138_p2), %v577_v7  ;;  %606 = vmatpush3.bf16.msra.mxu1 (!%p138_p2), %v577_v7  ;;  %v206_v56 = vld [vmem:[%s859_s2 + $0x40] sm:$0xff] (!%p138_p2)  ;;  %v201_v1 = vld [vmem:[%s859_s2 + $0x18] sm:$0xff] (!%p138_p2)  ;;  %v207_v2 = vld [vmem:[%s859_s2 + $0x48] sm:$0xff] (!%p138_p2) }
   0xd   : > { %579 = vmatprep.subr.bf16.mxu0 %v677_v3  ;;  %599 = vmatprep.subr.bf16.mxu1 %v677_v3  ;;  %s862_s13 = smov (!%p161_p3, %s461_s13), 1  ;;  %v202_v11 = vld [vmem:[%s859_s2 + $0x20] sm:$0xff]  ;;  %v208_v12 = vld [vmem:[%s859_s2 + $0x50] sm:$0x1] }
   0xe   : > { %s613_s21 = smul.u32 88, %s862_s13 }
  0x10   : > { %581 = vmatpush3.bf16.msra.mxu0 %v580_v10  ;;  %607 = vmatpush3.bf16.msra.mxu1 %v580_v10  ;;  %s772_s24 = scalar_lea.vmem %s857_s0, %s613_s21  ;;  %s841_s25 = scalar_lea.vmem %s860_s3, %s613_s21 }
  0x11   : > { %582 = vmatprep.subr.bf16.mxu0 %v677_v3  ;;  %600 = vmatprep.subr.bf16.mxu1 %v677_v3  ;;  %v171_v26 = vld [vmem:[%s772_s24] sm:$0xff]  ;;  %v177_v27 = vld [vmem:[%s772_s24 + $0x30] sm:$0xff]  ;;  %v172_v28 = vld [vmem:[%s772_s24 + $0x8] sm:$0xff] }
  0x12   : > { %v178_v29 = vld [vmem:[%s772_s24 + $0x38] sm:$0xff]  ;;  %v173_v30 = vld [vmem:[%s772_s24 + $0x10] sm:$0xff]  ;;  %v179_v31 = vld [vmem:[%s772_s24 + $0x40] sm:$0xff] }
  0x13   : > { %v174_v32 = vld [vmem:[%s772_s24 + $0x18] sm:$0xff]  ;;  %v180_v33 = vld [vmem:[%s772_s24 + $0x48] sm:$0xff]  ;;  %v175_v34 = vld [vmem:[%s772_s24 + $0x20] sm:$0xff] }
  0x14   : > { %584 = vmatpush3.bf16.msra.mxu0 %v583_v13  ;;  %608 = vmatpush3.bf16.msra.mxu1 %v583_v13  ;;  %v181_v35 = vld [vmem:[%s772_s24 + $0x50] sm:$0x1]  ;;  %v176_v36 = vld [vmem:[%s772_s24 + $0x28] sm:$0xff] }
  0x15   : > { %585 = vmatprep.subr.bf16.mxu0 %v677_v3  ;;  %601 = vmatprep.subr.bf16.mxu1 %v677_v3 }
  0x18   : > { %587 = vmatpush3.bf16.msra.mxu0 %v586_v16  ;;  %609 = vmatpush3.bf16.msra.mxu1 %v586_v16 }
  0x19   : > { %588 = vmatprep.subr.bf16.mxu0 %v677_v3  ;;  %602 = vmatprep.subr.bf16.mxu1 %v677_v3 }
  0x1c   : > { %590 = vmatpush3.bf16.msra.mxu0 %v589_v19  ;;  %610 = vmatpush3.bf16.msra.mxu1 %v589_v19 }
  0x1d   : > { %591 = vmatprep.subr.bf16.mxu0 %v677_v3  ;;  %603 = vmatprep.subr.bf16.mxu1 %v677_v3 }
  0x20   : > { %593 = vmatpush3.bf16.msra.mxu0 %v592_v22  ;;  %611 = vmatpush3.bf16.msra.mxu1 %v592_v22 }
  0x21   : > { %594 = vmatprep.subr.bf16.mxu0 %v677_v3  ;;  %604 = vmatprep.subr.bf16.mxu1 %v677_v3 }
  0x24   : > { %596 = vmatpush3.bf16.msra.mxu0 %v595_v25  ;;  %612 = vmatpush3.bf16.msra.mxu1 %v595_v25  ;;  %v203_v25 = vld [vmem:[%s859_s2 + $0x28] sm:$0xff] }
  0x27   : > { %541 = vmatmul.mubr.f32.vlgmr.msra.gmra.mrb[0].mxu0 %v171_v26  ;;  %559 = vmatmul.mubr.f32.vlgmr.msra.gmra.mrb[0].mxu1 %v177_v27 }
  0x28   : > { %543 = vmatprep.mubr.msk.f32.mxu0 %vm678_vm0, %v679_v6  ;;  %561 = vmatprep.mubr.msk.f32.mxu1 %vm678_vm0, %v679_v6 }
  0x2b   : > { %544 = vmatmul.mubr.f32.gmra.mrb[2].mxu0 %v172_v28  ;;  %562 = vmatmul.mubr.f32.gmra.mrb[2].mxu1 %v178_v29 }
  0x2c   : > { %546 = vmatprep.mubr.msk.f32.mxu0 %vm678_vm0, %v679_v6  ;;  %564 = vmatprep.mubr.msk.f32.mxu1 %vm678_vm0, %v679_v6 }
  0x2f   : > { %547 = vmatmul.mubr.f32.gmra.mrb[4].mxu0 %v173_v30  ;;  %565 = vmatmul.mubr.f32.gmra.mrb[4].mxu1 %v179_v31 }
  0x30   : > { %549 = vmatprep.mubr.msk.f32.mxu0 %vm678_vm0, %v679_v6  ;;  %567 = vmatprep.mubr.msk.f32.mxu1 %vm678_vm0, %v679_v6 }
  0x33   : > { %550 = vmatmul.mubr.f32.gmra.mrb[6].mxu0 %v174_v32  ;;  %568 = vmatmul.mubr.f32.gmra.mrb[6].mxu1 %v180_v33 }
  0x34   : > { %552 = vmatprep.mubr.msk.f32.mxu0 %vm678_vm0, %v679_v6  ;;  %570 = vmatprep.mubr.msk.f32.mxu1 %vm678_vm0, %v679_v6 }
  0x37   : > { %553 = vmatmul.mubr.f32.gmra.mrb[8].mxu0 %v175_v34  ;;  %571 = vmatmul.mubr.f32.gmra.mrb[8].mxu1 %v181_v35 }
  0x38   : > { %555 = vmatprep.mubr.msk.f32.mxu0 %vm678_vm0, %v679_v6 }
  0x3b   : > { %556 = vmatmul.mubr.f32.gmra.mrb[10].mxu0 %v176_v36 }
  0xfa   : > { %v275_v39 = vpop.f32.mrb[0].mxu0  ;;  %v305_v40 = vpop.f32.mrb[0].mxu1 }
  0xfb   : > { %v276_v41 = vadd.f32 %v275_v39, %v198_v37  ;;  %v542_v42 = vpop.f32.mrb[1].mxu0  ;;  %v306_v43 = vadd.f32 %v305_v40, %v204_v38  ;;  %v560_v44 = vpop.f32.mrb[1].mxu1 }
  0xfd   : > { %v468_v47 = vmul.f32 -1.442695, %v276_v41  ;;  %v474_v48 = vmul.f32 -1.442695, %v306_v43 }
  0xfe   : > { %v280_v49 = vpop.f32.mrb[2].mxu0  ;;  %v310_v50 = vpop.f32.mrb[2].mxu1 }
  0xff   : > { %625 = vpow2.f32 %v468_v47  ;;  %v281_v51 = vadd.f32 %v280_v49, %v199_v45  ;;  %v545_v52 = vpop.f32.mrb[3].mxu0  ;;  %v311_v53 = vadd.f32 %v310_v50, %v205_v46  ;;  %v563_v54 = vpop.f32.mrb[3].mxu1 }
 0x100   : > { %627 = vpow2.f32 %v474_v48 }
 0x101   : > { %v469_v57 = vmul.f32 -1.442695, %v281_v51  ;;  %v475_v58 = vmul.f32 -1.442695, %v311_v53 }
 0x102   : > { %v285_v59 = vpop.f32.mrb[4].mxu0  ;;  %v315_v60 = vpop.f32.mrb[4].mxu1 }
 0x103   : > { %629 = vpow2.f32 %v469_v57  ;;  %v286_v61 = vadd.f32 %v285_v59, %v200_v55  ;;  %v548_v62 = vpop.f32.mrb[5].mxu0  ;;  %v316_v63 = vadd.f32 %v315_v60, %v206_v56  ;;  %v566_v0 = vpop.f32.mrb[5].mxu1 }
 0x104   : > { %631 = vpow2.f32 %v475_v58 }
 0x105   : > { %v470_v3 = vmul.f32 -1.442695, %v286_v61  ;;  %v476_v4 = vmul.f32 -1.442695, %v316_v63 }
 0x106   : > { %v290_v5 = vpop.f32.mrb[6].mxu0  ;;  %v320_v6 = vpop.f32.mrb[6].mxu1 }
 0x107   : > { %633 = vpow2.f32 %v470_v3  ;;  %v291_v7 = vadd.f32 %v290_v5, %v201_v1  ;;  %v551_v8 = vpop.f32.mrb[7].mxu0  ;;  %v321_v9 = vadd.f32 %v320_v6, %v207_v2  ;;  %v569_v10 = vpop.f32.mrb[7].mxu1 }
 0x108   : > { %635 = vpow2.f32 %v476_v4 }
 0x109   : > { %v626_v13 = vpop.eup %625  ;;  %v471_v14 = vmul.f32 -1.442695, %v291_v7  ;;  %v477_v17 = vmul.f32 -1.442695, %v321_v9 }
 0x10a   : > { %v628_v15 = vpop.eup %627  ;;  %v362_v16 = vadd.f32 1.0, %v626_v13  ;;  %v295_v18 = vpop.f32.mrb[8].mxu0 }
 0x10b   : > { %v325_v19 = vpop.f32.mrb[8].mxu1  ;;  %v368_v20 = vadd.f32 1.0, %v628_v15  ;;  %637 = vpow2.f32 %v471_v14  ;;  %v296_v21 = vadd.f32 %v295_v18, %v202_v11  ;;  %v554_v22 = vpop.f32.mrb[9].mxu0 }
 0x10c   : > { %v326_v23 = vadd.f32 %v325_v19, %v208_v12  ;;  %v572_v24 = vpop.f32.mrb[9].mxu1  ;;  %639 = vrcp.f32 %v362_v16 }
 0x10d   : > { %v630_v26 = vpop.eup %629  ;;  %641 = vrcp.f32 %v368_v20  ;;  %v472_v27 = vmul.f32 -1.442695, %v296_v21 }
 0x10e   : > { %v632_v28 = vpop.eup %631  ;;  %v363_v29 = vadd.f32 1.0, %v630_v26  ;;  %643 = vpow2.f32 %v477_v17  ;;  %v478_v30 = vmul.f32 -1.442695, %v326_v23  ;;  %v300_v31 = vpop.f32.mrb[10].mxu0 }
 0x10f   : > { %v369_v32 = vadd.f32 1.0, %v632_v28  ;;  %645 = vpow2.f32 %v472_v27  ;;  %v301_v33 = vadd.f32 %v300_v31, %v203_v25  ;;  %v557_v34 = vpop.f32.mrb[11].mxu0 }
 0x110   : > { %647 = vrcp.f32 %v363_v29 }
 0x111   : > { %v634_v35 = vpop.eup %633  ;;  %649 = vrcp.f32 %v369_v32  ;;  %v473_v36 = vmul.f32 -1.442695, %v301_v33 }
 0x112   : > { %v636_v37 = vpop.eup %635  ;;  %v364_v38 = vadd.f32 1.0, %v634_v35  ;;  %651 = vpow2.f32 %v478_v30 }
 0x113   : > { %v370_v39 = vadd.f32 1.0, %v636_v37  ;;  %653 = vpow2.f32 %v473_v36 }
 0x114   : > { %655 = vrcp.f32 %v364_v38 }
 0x115   : > { %v638_v40 = vpop.eup %637  ;;  %657 = vrcp.f32 %v370_v39 }
 0x116   : > { %v640_v41 = vpop.eup %639  ;;  %v365_v42 = vadd.f32 1.0, %v638_v40 }
 0x117   : > { %v642_v43 = vpop.eup %641  ;;  %395 = vst [vmem:[%s841_s25] sm:$0xff] %v640_v41 }
 0x118   : > { %v644_v44 = vpop.eup %643  ;;  %401 = vst [vmem:[%s841_s25 + $0x30] sm:$0xff] %v642_v43  ;;  %659 = vrcp.f32 %v365_v42 }
 0x119   : > { %v646_v45 = vpop.eup %645  ;;  %v371_v46 = vadd.f32 1.0, %v644_v44 }
 0x11a   : > { %v648_v47 = vpop.eup %647  ;;  %v366_v48 = vadd.f32 1.0, %v646_v45 }
 0x11b   : > { %v650_v49 = vpop.eup %649  ;;  %396 = vst [vmem:[%s841_s25 + $0x8] sm:$0xff] %v648_v47  ;;  %661 = vrcp.f32 %v371_v46 }
 0x11c   : > { %v652_v50 = vpop.eup %651  ;;  %402 = vst [vmem:[%s841_s25 + $0x38] sm:$0xff] %v650_v49  ;;  %663 = vrcp.f32 %v366_v48 }
 0x11d   : > { %v654_v51 = vpop.eup %653  ;;  %v372_v52 = vadd.f32 1.0, %v652_v50 }
 0x11e   : > { %v656_v53 = vpop.eup %655  ;;  %v367_v54 = vadd.f32 1.0, %v654_v51 }
 0x11f   : > { %v658_v55 = vpop.eup %657  ;;  %397 = vst [vmem:[%s841_s25 + $0x10] sm:$0xff] %v656_v53  ;;  %665 = vrcp.f32 %v372_v52 }
 0x120   : > { %403 = vst [vmem:[%s841_s25 + $0x40] sm:$0xff] %v658_v55  ;;  %667 = vrcp.f32 %v367_v54 }
 0x122   : > { %v660_v56 = vpop.eup %659 }
 0x123   : > { %398 = vst [vmem:[%s841_s25 + $0x18] sm:$0xff] %v660_v56 }
 0x125   : > { %v662_v57 = vpop.eup %661 }
 0x126   : > { %v664_v58 = vpop.eup %663  ;;  %404 = vst [vmem:[%s841_s25 + $0x48] sm:$0xff] %v662_v57 }
 0x127   : > { %399 = vst [vmem:[%s841_s25 + $0x20] sm:$0xff] %v664_v58 }
 0x129   : > { %v666_v59 = vpop.eup %665 }
 0x12a   : > { %v668_v60 = vpop.eup %667  ;;  %405 = vst [vmem:[%s841_s25 + $0x50] sm:$0x1] %v666_v59 }
 0x12b   : > { %400 = vst [vmem:[%s841_s25 + $0x28] sm:$0xff] %v668_v60 }
 0x12c PF: > { %s13_s12 = sadd.s32 1, %s675_s12  }
 0x12d   : > { %p10_p4 = scmp.ge.s32.totalorder %s13_s12, 4  }
 0x12f   :  { %12 = sbr.rel (!%p10_p4) target bundleno = 1 (0x1), region = 62 }

</bundles_post_ra>
